<compile_context>
chip_gen: v7x
topology: tpu7x:2x2x1
jax: 0.10.0
libtpu: 0.0.40
codegen_flags: <defaults>
</compile_context>

<pallas_src>
import functools

import jax
import jax.numpy as jnp
from jax.experimental import pallas as pl
from jax.experimental.pallas import tpu as pltpu


LANE = 128        # vreg lane width
SUBLANE = 8       # f32 sublane count
TILE_B_MAX = 512  # rows per grid step (large tiles amortize ~0.35us/step overhead)


def _round_up(x, m):
    return ((x + m - 1) // m) * m


# ---------------------------------------------------------------------------
# Pallas kernel: fused  relu(x @ W1 + b1) @ W2 + b2   (one batch tile per step)
# ---------------------------------------------------------------------------
def _mlp_kernel(x_ref, w1_ref, b1_ref, w2_ref, b2_ref, o_ref):
    x = x_ref[...]                                              # (TILE_B, Din_p) bf16
    # First matmul on the MXU, f32 accumulation.
    h = jnp.dot(x, w1_ref[...], preferred_element_type=jnp.float32)
    # Bias add + ReLU in f32 (v5e VPU has no bf16).
    h = jnp.maximum(h + b1_ref[...], 0.0)
    # dropout: identity at inference (no masking / scaling).
    # Cast only at the second MXU input; accumulate in f32 again.
    out = jnp.dot(h.astype(w2_ref.dtype), w2_ref[...],
                  preferred_element_type=jnp.float32)
    o_ref[...] = (out + b2_ref[...]).astype(o_ref.dtype)


@functools.partial(jax.jit, static_argnames=("n_output_true",))
def mlp_pallas(emb, w1_p, b1_p, w2_p, b2_p, *, n_output_true):
    """emb: (B, n_input) f32 -> logits (B, n_output_true) f32.

    w1_p/w2_p are pre-padded bf16 (Din_p, H_p)/(H_p, Nout_p); b1_p/b2_p are
    f32 (1, H_p)/(1, Nout_p). Padding columns/rows are zero.
    """
    B, n_input = emb.shape
    d_in_p, h_p = w1_p.shape
    _, n_out_p = w2_p.shape

    # --- batch/feature padding so every block is (8, 128)-aligned ------------
    tile_b = min(TILE_B_MAX, _round_up(B, SUBLANE))
    b_pad = _round_up(B, tile_b)

    x = emb.astype(jnp.bfloat16)
    x = jnp.pad(x, ((0, b_pad - B), (0, d_in_p - n_input)))

    grid = (pl.cdiv(b_pad, tile_b),)

    # --- VMEM budget: resident weights + double-buffered activation tiles ----
    weight_bytes = (w1_p.size + w2_p.size) * 2 + (b1_p.size + b2_p.size) * 4
    act_bytes = 2 * (tile_b * d_in_p * 2 + tile_b * n_out_p * 4)   # 2x double-buffer
    scratch_bytes = 2 * tile_b * h_p * 4                           # f32 intermediates
    vmem_limit = min(64 * 2 ** 20,
                     max(8 * 2 ** 20, 2 * (weight_bytes + act_bytes + scratch_bytes)))

    flops = 2 * b_pad * (d_in_p * h_p + h_p * n_out_p)
    bytes_accessed = (b_pad * d_in_p * 2 + weight_bytes + b_pad * n_out_p * 4)

    out_padded = pl.pallas_call(
        _mlp_kernel,
        out_shape=jax.ShapeDtypeStruct((b_pad, n_out_p), jnp.float32),
        grid=grid,
        in_specs=[
            pl.BlockSpec((tile_b, d_in_p), lambda i: (i, 0)),   # activations (pipelined)
            pl.BlockSpec((d_in_p, h_p),    lambda i: (0, 0)),   # W1 (resident)
            pl.BlockSpec((1, h_p),         lambda i: (0, 0)),   # b1 (resident)
            pl.BlockSpec((h_p, n_out_p),   lambda i: (0, 0)),   # W2 (resident)
            pl.BlockSpec((1, n_out_p),     lambda i: (0, 0)),   # b2 (resident)
        ],
        out_specs=pl.BlockSpec((tile_b, n_out_p), lambda i: (i, 0)),
        compiler_params=pltpu.CompilerParams(
            dimension_semantics=("parallel",),
            vmem_limit_bytes=vmem_limit,
        ),
        cost_estimate=pl.CostEstimate(
            flops=flops, transcendentals=0, bytes_accessed=bytes_accessed),
    )(x, w1_p, b1_p, w2_p, b2_p)

    # Slice off batch + output-class padding.
    return out_padded[:B, :n_output_true]


# ---------------------------------------------------------------------------
# Parameter init (mirrors nn.Linear + xavier_uniform / zeros), pre-padded.
# ---------------------------------------------------------------------------
def xavier_uniform(key, fan_in, fan_out):
    a = (6.0 / (fan_in + fan_out)) ** 0.5
    # stored as (in, out) so kernel computes x @ W (== x @ weight.T in PyTorch)
    return jax.random.uniform(key, (fan_in, fan_out), jnp.float32, -a, a)


def make_params(key, vocab_size, n_input, hidden_dim, n_output):
    k_emb, k_w1, k_w2 = jax.random.split(key, 3)

    d_in_p = _round_up(n_input, LANE)
    h_p = _round_up(hidden_dim, LANE)
    n_out_p = _round_up(n_output, LANE)

    w1 = xavier_uniform(k_w1, n_input, hidden_dim)
    w2 = xavier_uniform(k_w2, hidden_dim, n_output)

    # Zero-pad to lane-aligned shapes; padded rows/cols contribute nothing.
    w1_p = jnp.zeros((d_in_p, h_p), jnp.float32).at[:n_input, :hidden_dim].set(w1)
    w2_p = jnp.zeros((h_p, n_out_p), jnp.float32).at[:hidden_dim, :n_output].set(w2)

    params = {
        # synthetic "encoder": embedding table (stand-in for the transformer encoder)
        "emb_table": jax.random.normal(k_emb, (vocab_size, n_input), jnp.float32) * 0.02,
        "w1": w1_p.astype(jnp.bfloat16),          # bf16 storage, f32 accumulation
        "b1": jnp.zeros((1, h_p), jnp.float32),
        "w2": w2_p.astype(jnp.bfloat16),
        "b2": jnp.zeros((1, n_out_p), jnp.float32),
        "n_output": n_output,
    }
    return params


# ---------------------------------------------------------------------------
# Forward pass = encoder (plain-JAX glue) + fused Pallas MLP classifier head
# ---------------------------------------------------------------------------
def feedforward_classifier_forward(params, tokens):
    # Encoder stand-in: embedding lookup + mean-pool over sequence -> (B, n_input).
    emb = jnp.take(params["emb_table"], tokens, axis=0)    # (B, S, n_input)
    emb = jnp.mean(emb, axis=1)                            # (B, n_input)
    return mlp_pallas(emb, params["w1"], params["b1"], params["w2"], params["b2"],
                      n_output_true=params["n_output"])


def reference_forward(params, tokens):
    """Pure-JAX reference using the same bf16 weights / f32 accumulation."""
    emb = jnp.take(params["emb_table"], tokens, axis=0)
    emb = jnp.mean(emb, axis=1)
    n_input = emb.shape[1]
    d_in_p = params["w1"].shape[0]
    x = jnp.pad(emb.astype(jnp.bfloat16), ((0, 0), (0, d_in_p - n_input)))
    h = jnp.dot(x, params["w1"], preferred_element_type=jnp.float32) + params["b1"]
    h = jnp.maximum(h, 0.0)
    out = jnp.dot(h.astype(jnp.bfloat16), params["w2"],
                  preferred_element_type=jnp.float32) + params["b2"]
    return out[:, :params["n_output"]]


if __name__ == "__main__":
    # Small shapes consistent with the module's forward contract.
    batch, seq = 2, 8
    vocab_size = 100
    n_input, hidden_dim, n_output = 32, 64, 8

    key = jax.random.PRNGKey(0)
    k_params, k_tokens = jax.random.split(key)

    params = make_params(k_params, vocab_size, n_input, hidden_dim, n_output)
    tokens = jax.random.randint(k_tokens, (batch, seq), 0, vocab_size, jnp.int32)

    logits = feedforward_classifier_forward(params, tokens)
    logits = jax.block_until_ready(logits)

    ref = jax.block_until_ready(reference_forward(params, tokens))
    assert logits.shape == (batch, n_output), logits.shape
    assert jnp.allclose(logits, ref, atol=1e-2, rtol=1e-2), (logits, ref)

    print("KERNEL_OK")
</pallas_src>

<mosaic_0001>
module attributes {stable_mosaic.version = 11 : i64} {
  func.func @_mlp_kernel(%arg0: i32, %arg1: memref<8x128xbf16, #tpu.memory_space<vmem>>, %arg2: memref<128x128xbf16, #tpu.memory_space<vmem>>, %arg3: memref<1x128xf32, #tpu.memory_space<vmem>>, %arg4: memref<128x128xbf16, #tpu.memory_space<vmem>>, %arg5: memref<1x128xf32, #tpu.memory_space<vmem>>, %arg6: memref<8x128xf32, #tpu.memory_space<vmem>>) attributes {dimension_semantics = [#tpu.dimension_semantics<parallel>], iteration_bounds = array<i64: 1>, scalar_prefetch = 0 : i64, scratch_operands = 0 : i64, tpu.core_type = #tpu.core_type<tc>, window_params = [{transform_indices = @transform_0, window_bounds = array<i64: 8, 128>}, {pipeline_mode = #tpu.pipeline_mode<synchronous>, transform_indices = @transform_1, window_bounds = array<i64: 128, 128>}, {pipeline_mode = #tpu.pipeline_mode<synchronous>, transform_indices = @transform_2, window_bounds = array<i64: 1, 128>}, {pipeline_mode = #tpu.pipeline_mode<synchronous>, transform_indices = @transform_3, window_bounds = array<i64: 128, 128>}, {pipeline_mode = #tpu.pipeline_mode<synchronous>, transform_indices = @transform_4, window_bounds = array<i64: 1, 128>}, {transform_indices = @transform_5, window_bounds = array<i64: 8, 128>}]} {
    %c0 = arith.constant 0 : index
    %c0_0 = arith.constant 0 : index
    %0 = vector.load %arg1[%c0, %c0_0] : memref<8x128xbf16, #tpu.memory_space<vmem>>, vector<8x128xbf16>
    %c0_1 = arith.constant 0 : index
    %c0_2 = arith.constant 0 : index
    %1 = vector.load %arg2[%c0_1, %c0_2] : memref<128x128xbf16, #tpu.memory_space<vmem>>, vector<128x128xbf16>
    %cst = arith.constant dense<0.000000e+00> : vector<8x128xf32>
    %2 = tpu.matmul %0, %1, %cst {dimension_numbers = #tpu.dot_dimension_numbers<[1], [0], [0], [1], [0, 0, 1, 1], [], []>} : vector<8x128xbf16>, vector<128x128xbf16>, vector<8x128xf32> -> vector<8x128xf32>
    %c0_3 = arith.constant 0 : index
    %c0_4 = arith.constant 0 : index
    %3 = vector.load %arg3[%c0_3, %c0_4] : memref<1x128xf32, #tpu.memory_space<vmem>>, vector<1x128xf32>
    %4 = vector.broadcast %3 : vector<1x128xf32> to vector<8x128xf32>
    %5 = arith.addf %2, %4 : vector<8x128xf32>
    %cst_5 = arith.constant 0.000000e+00 : f32
    %6 = vector.broadcast %cst_5 : f32 to vector<8x128xf32>
    %7 = arith.maximumf %5, %6 : vector<8x128xf32>
    %8 = arith.truncf %7 : vector<8x128xf32> to vector<8x128xbf16>
    %c0_6 = arith.constant 0 : index
    %c0_7 = arith.constant 0 : index
    %9 = vector.load %arg4[%c0_6, %c0_7] : memref<128x128xbf16, #tpu.memory_space<vmem>>, vector<128x128xbf16>
    %cst_8 = arith.constant dense<0.000000e+00> : vector<8x128xf32>
    %10 = tpu.matmul %8, %9, %cst_8 {dimension_numbers = #tpu.dot_dimension_numbers<[1], [0], [0], [1], [0, 0, 1, 1], [], []>} : vector<8x128xbf16>, vector<128x128xbf16>, vector<8x128xf32> -> vector<8x128xf32>
    %c0_9 = arith.constant 0 : index
    %c0_10 = arith.constant 0 : index
    %11 = vector.load %arg5[%c0_9, %c0_10] : memref<1x128xf32, #tpu.memory_space<vmem>>, vector<1x128xf32>
    %12 = vector.broadcast %11 : vector<1x128xf32> to vector<8x128xf32>
    %13 = arith.addf %10, %12 : vector<8x128xf32>
    %c0_11 = arith.constant 0 : index
    %c0_12 = arith.constant 0 : index
    %14 = vector.load %arg6[%c0_11, %c0_12] : memref<8x128xf32, #tpu.memory_space<vmem>>, vector<8x128xf32>
    tpu.vector_store %arg6[%c0_11, %c0_12], %13 {strides = array<i32>} : memref<8x128xf32, #tpu.memory_space<vmem>>, vector<8x128xf32>,
    return
  }
  func.func @transform_0(%arg0: i32) -> (i32, i32) {
    %c0_i32 = arith.constant 0 : i32
    %c0_i32_0 = arith.constant 0 : i32
    return %arg0, %c0_i32 : i32, i32
  }
  func.func @transform_1(%arg0: i32) -> (i32, i32) {
    %c0_i32 = arith.constant 0 : i32
    %c0_i32_0 = arith.constant 0 : i32
    %c0_i32_1 = arith.constant 0 : i32
    return %c0_i32, %c0_i32_0 : i32, i32
  }
  func.func @transform_2(%arg0: i32) -> (i32, i32) {
    %c0_i32 = arith.constant 0 : i32
    %c0_i32_0 = arith.constant 0 : i32
    %c0_i32_1 = arith.constant 0 : i32
    return %c0_i32, %c0_i32_0 : i32, i32
  }
  func.func @transform_3(%arg0: i32) -> (i32, i32) {
    %c0_i32 = arith.constant 0 : i32
    %c0_i32_0 = arith.constant 0 : i32
    %c0_i32_1 = arith.constant 0 : i32
    return %c0_i32, %c0_i32_0 : i32, i32
  }
  func.func @transform_4(%arg0: i32) -> (i32, i32) {
    %c0_i32 = arith.constant 0 : i32
    %c0_i32_0 = arith.constant 0 : i32
    %c0_i32_1 = arith.constant 0 : i32
    return %c0_i32, %c0_i32_0 : i32, i32
  }
  func.func @transform_5(%arg0: i32) -> (i32, i32) {
    %c0_i32 = arith.constant 0 : i32
    %c0_i32_0 = arith.constant 0 : i32
    return %arg0, %c0_i32 : i32, i32
  }
}

</mosaic_0001>

<bundles_post_ra>
// kernel: mlp_pallas.1
= control target key start
LH: loop header
LB: loop body
LE: loop exit
PB: predicated region body
PF: predicated region fallthrough
CT: control target
= control target key end

     0   :  { %10 = vsyncpa [#allocation3], 0  ;;  %s499_s0 = inlined_call_operand.vmem [shape: bf16[8,128], index: 0, kind: input, shape index: {}]   ;;  %s500_s1 = inlined_call_operand.hbm [shape: bf16[128,128], index: 1, kind: input, shape index: {}]   ;;  %s501_s2 = inlined_call_operand.vmem [shape: f32[1,128], index: 2, kind: input, shape index: {}]   ;;  %s502_s3 = inlined_call_operand.hbm [shape: bf16[128,128], index: 3, kind: input, shape index: {}]   ;;  %s503_s4 = inlined_call_operand.vmem [shape: f32[1,128], index: 4, kind: input, shape index: {}]   ;;  %s504_s5 = inlined_call_operand.vmem [shape: f32[8,128], index: 5, kind: output, shape index: {}]  }
   0x1   :  { %11 = vsyncpa [#allocation5], 0  ;;  %s427_s18 = smov [#allocation2]   ;;  %s379_s22 = scalar_lea.hbm %s500_s1, 1024 }
   0x2   :  { %s19_s19 = sshll.u32 %s427_s18, 4  ;;  %p380_p0 = scmp.ne.s32.totalorder %s500_s1, %s379_s22  ;;  %s20_s19 = int_to_ptr.vmem [resolvable:$true] %s19_s19 }
   0x3   :  { %p383_p1 = scmp.lt.u32.totalorder %s379_s22, %s500_s1 }
   0x5   :  { %p385_p2 = pnand %p383_p1, %p380_p0 }
   0x7   :  { %388 = shalt.err (!%p385_p2)
}
   0x8   :  { %s389_s27 = scalar_lea.vmem %s20_s19, 1024  ;;  %p394_p4 = scmp.lt.s32.totalorder %s20_s19, %s20_s19 }
   0x9   :  { %p390_p3 = scmp.ne.s32.totalorder %s20_s19, %s389_s27  ;;  %p395_p5 = scmp.lt.s32.totalorder %s389_s27, %s389_s27 }
   0xb   :  { %p396_p6 = por %p395_p5, %p394_p4 }
   0xd   :  { %p397_p7 = pnand %p396_p6, %p390_p3 }
   0xf   :  { %400 = shalt.err (!%p397_p7)
}
  0x10   :  { %s428_s28 = smov 64   ;;  %s429_s29 = smov 4  }
  0x11   :  { %25 = dma.hbm_to_vmem [thread:$0]  %s500_s1, 1024, %s20_s19, [#allocation3], %s428_s28, %s428_s28, %s429_s29  }
  0x12   :  { %s430_s7 = smov [#allocation4]   ;;  %s401_s11 = scalar_lea.hbm %s502_s3, 1024 }
  0x13   :  { %s33_s8 = sshll.u32 %s430_s7, 4  ;;  %p402_p8 = scmp.ne.s32.totalorder %s502_s3, %s401_s11  ;;  %s34_s8 = int_to_ptr.vmem [resolvable:$true] %s33_s8 }
  0x14   :  { %p405_p9 = scmp.lt.u32.totalorder %s401_s11, %s502_s3 }
  0x16   :  { %p407_p10 = pnand %p405_p9, %p402_p8 }
  0x18   :  { %410 = shalt.err (!%p407_p10)
}
  0x19   :  { %s411_s16 = scalar_lea.vmem %s34_s8, 1024  ;;  %p416_p12 = scmp.lt.s32.totalorder %s34_s8, %s34_s8 }
  0x1a   :  { %p412_p11 = scmp.ne.s32.totalorder %s34_s8, %s411_s16  ;;  %p417_p13 = scmp.lt.s32.totalorder %s411_s16, %s411_s16 }
  0x1c   :  { %p418_p0 = por %p417_p13, %p416_p12 }
  0x1e   :  { %p419_p1 = pnand %p418_p0, %p412_p11 }
  0x20   :  { %422 = shalt.err (!%p419_p1)
}
  0x21   :  { %39 = dma.hbm_to_vmem [thread:$0]  %s502_s3, 1024, %s34_s8, [#allocation5], %s428_s28, %s428_s28, %s429_s29  }
  0x22   :  { %423 = dma.done.wait [#allocation3], 1024  }
  0x23   :  { %424 = vsyncadd [#allocation3], 4294966272 }
  0x24   :  { %425 = dma.done.wait [#allocation5], 1024  }
  0x25   :  { %426 = vsyncadd [#allocation5], 4294966272  ;;  %v431_v0 = vmov 0.0   ;;  %vm432_vm0 = vmmov 0   ;;  %v363_v1 = vld [vmem:[#allocation2] sm:$0xff]   ;;  %v364_v2 = vld [vmem:[#allocation2 + $0x8] sm:$0xff]  }
  0x26   :  { %317 = vmatprep.subr.bf16.mxu0 %v431_v0  ;;  %333 = vmatprep.mubr.msk.bf16.mxu0 %vm432_vm0, %v431_v0  ;;  %v365_v3 = vld [vmem:[#allocation2 + $0x10] sm:$0xff]   ;;  %v371_v4 = vld [vmem:[#allocation4] sm:$0xff]   ;;  %v366_v5 = vld [vmem:[#allocation2 + $0x18] sm:$0xff]  }
  0x27   :  { %337 = vmatprep.subr.bf16.mxu1 %v431_v0  ;;  %353 = vmatprep.mubr.msk.bf16.mxu1 %vm432_vm0, %v431_v0  ;;  %v372_v6 = vld [vmem:[#allocation4 + $0x8] sm:$0xff]   ;;  %v367_v7 = vld [vmem:[#allocation2 + $0x20] sm:$0xff]   ;;  %v373_v8 = vld [vmem:[#allocation4 + $0x10] sm:$0xff]  }
  0x28   :  { %318 = vmatpush3.bf16.msra.mxu0 %v363_v1  ;;  %338 = vmatpush3.bf16.msra.mxu1 %v371_v4  ;;  %v368_v9 = vld [vmem:[#allocation2 + $0x28] sm:$0xff]   ;;  %v374_v10 = vld [vmem:[#allocation4 + $0x18] sm:$0xff]   ;;  %v369_v11 = vld [vmem:[#allocation2 + $0x30] sm:$0xff]  }
  0x29   :  { %319 = vmatprep.subr.bf16.mxu0 %v431_v0  ;;  %339 = vmatprep.subr.bf16.mxu1 %v431_v0  ;;  %v375_v12 = vld [vmem:[#allocation4 + $0x20] sm:$0xff]   ;;  %v370_v13 = vld [vmem:[#allocation2 + $0x38] sm:$0xff]   ;;  %v376_v14 = vld [vmem:[#allocation4 + $0x28] sm:$0xff]  }
  0x2a   :  { %v49_v15 = vld [vmem:[%s499_s0] sm:$0xf]  ;;  %v377_v16 = vld [vmem:[#allocation4 + $0x30] sm:$0xff]   ;;  %v378_v17 = vld [vmem:[#allocation4 + $0x38] sm:$0xff]  }
  0x2b   :  { %v281_v18 = vld [vmem:[%s501_s2] ss:$0 sm:$0xff] }
  0x2c   :  { %320 = vmatpush3.bf16.msra.mxu0 %v364_v2  ;;  %340 = vmatpush3.bf16.msra.mxu1 %v372_v6  ;;  %v290_v26 = vld [vmem:[%s503_s4] ss:$0 sm:$0xff] }
  0x2d   :  { %321 = vmatprep.subr.bf16.mxu0 %v431_v0  ;;  %341 = vmatprep.subr.bf16.mxu1 %v431_v0 }
  0x30   :  { %322 = vmatpush3.bf16.msra.mxu0 %v365_v3  ;;  %342 = vmatpush3.bf16.msra.mxu1 %v373_v8 }
  0x31   :  { %323 = vmatprep.subr.bf16.mxu0 %v431_v0  ;;  %343 = vmatprep.subr.bf16.mxu1 %v431_v0 }
  0x34   :  { %324 = vmatpush3.bf16.msra.mxu0 %v366_v5  ;;  %344 = vmatpush3.bf16.msra.mxu1 %v374_v10 }
  0x35   :  { %325 = vmatprep.subr.bf16.mxu0 %v431_v0  ;;  %345 = vmatprep.subr.bf16.mxu1 %v431_v0 }
  0x38   :  { %326 = vmatpush3.bf16.msra.mxu0 %v367_v7  ;;  %346 = vmatpush3.bf16.msra.mxu1 %v375_v12 }
  0x39   :  { %327 = vmatprep.subr.bf16.mxu0 %v431_v0  ;;  %347 = vmatprep.subr.bf16.mxu1 %v431_v0 }
  0x3c   :  { %328 = vmatpush3.bf16.msra.mxu0 %v368_v9  ;;  %348 = vmatpush3.bf16.msra.mxu1 %v376_v14 }
  0x3d   :  { %329 = vmatprep.subr.bf16.mxu0 %v431_v0  ;;  %349 = vmatprep.subr.bf16.mxu1 %v431_v0 }
  0x40   :  { %330 = vmatpush3.bf16.msra.mxu0 %v369_v11  ;;  %350 = vmatpush3.bf16.msra.mxu1 %v377_v16 }
  0x41   :  { %331 = vmatprep.subr.bf16.mxu0 %v431_v0  ;;  %351 = vmatprep.subr.bf16.mxu1 %v431_v0 }
  0x44   :  { %332 = vmatpush3.bf16.msra.mxu0 %v370_v13  ;;  %352 = vmatpush3.bf16.msra.mxu1 %v378_v17 }
  0x47   :  { %334 = vmatmul.mubr.bf16.vlgmr.msra.gmra.mrb[0].mxu0 %v49_v15 }
 0x11a   :  { %v155_v19 = vpop.f32.mrb[0].mxu0 }
 0x11b   :  { %v156_v20 = vadd.f32 %v281_v18, %v155_v19  ;;  %v335_v21 = vpop.f32.mrb[1].mxu0 }
 0x11c   :  { %v158_v22 = vpop.f32.mrb[2].mxu0 }
 0x11d   :  { %v161_v23 = vmax.f32 %v156_v20, 0.0  ;;  %v336_v24 = vpop.f32.mrb[3].mxu0 }
 0x11f   :  { %v162_v25 = vpack.c.bf16 %v161_v23, %v161_v23 }
 0x121   :  { %354 = vmatmul.mubr.bf16.vlgmr.msra.gmra.mrb[0].mxu1 %v162_v25 }
 0x1f4   :  { %v268_v27 = vpop.f32.mrb[0].mxu1 }
 0x1f5   :  { %v269_v28 = vadd.f32 %v290_v26, %v268_v27  ;;  %v355_v29 = vpop.f32.mrb[1].mxu1 }
 0x1f6   :  { %v271_v30 = vpop.f32.mrb[2].mxu1 }
 0x1f7   :  { %274 = vst [vmem:[%s504_s5] sm:$0xff] %v269_v28  ;;  %v356_v31 = vpop.f32.mrb[3].mxu1 }
 0x1f8   :  { %279 = vsyncpa [#allocation3], 1 }
 0x1f9   :  { %280 = vsyncpa [#allocation5], 1 }

</bundles_post_ra>
